<compile_context>
chip_gen: v6e
topology: v6e:2x2x1
jax: 0.10.0
libtpu: 0.0.40
codegen_flags: <defaults>
</compile_context>

<pallas_src>
import functools
import math

import jax
import jax.numpy as jnp
from jax.experimental import pallas as pl
from jax.experimental.pallas import tpu as pltpu


# ---------------------------------------------------------------------------
# Pallas kernel: torch-style (annotated-transformer) LayerNorm over last dim.
# ---------------------------------------------------------------------------
def _layer_norm_kernel(x_ref, gamma_ref, beta_ref, out_ref, *, eps, d_model):
    x = x_ref[...].astype(jnp.float32)                       # (T, D)
    mean = jnp.sum(x, axis=-1, keepdims=True) * (1.0 / d_model)
    centered = x - mean
    # torch.Tensor.std defaults to the unbiased estimator (ddof = 1).
    var = jnp.sum(centered * centered, axis=-1, keepdims=True) * (
        1.0 / (d_model - 1))
    std = jnp.sqrt(var)
    # (T,1) reciprocal on the EUP slot; full-tile op becomes a VPU multiply.
    inv = pl.reciprocal(std + eps, approx=False)
    y = gamma_ref[...] * (centered * inv) + beta_ref[...]
    out_ref[...] = y.astype(out_ref.dtype)


def layer_norm(x, gamma, beta, *, eps=1e-6, max_block_rows=1024,
               block_bytes_target=4 * 1024 * 1024):
    """Torch-semantics LayerNorm over the last dim of x, any leading shape."""
    orig_shape = x.shape
    d_model = orig_shape[-1]
    assert d_model > 1, "LayerNorm with unbiased std needs d_model > 1"
    # TODO(synk): if d_model is not a multiple of 128, output stores are
    # partially masked (vst.msk); a masked feature-dim pad could recover
    # lane-dense stores but is not needed for typical transformer widths.

    n = math.prod(orig_shape[:-1]) if orig_shape[:-1] else 1
    x2 = x.reshape(n, d_model)

    # Row tile: multiple of 8, sized so the f32 working block is ~4 MiB
    # (near the measured ~85% HBM-roofline knee), capped at max_block_rows
    # and at the 8-rounded row count so tiny inputs get one full block.
    rows_for_target = max(8, block_bytes_target // (d_model * 4))
    t = min(max_block_rows, rows_for_target)
    t = max(8, (t // 8) * 8)
    n_pad8 = pl.cdiv(n, 8) * 8
    t = min(t, n_pad8)
    grid = (pl.cdiv(n, t),)      # ragged last block: OK, rows are independent

    gamma2 = gamma.reshape(1, d_model).astype(jnp.float32)
    beta2 = beta.reshape(1, d_model).astype(jnp.float32)

    # Scoped VMEM: double-buffered input + output tiles (+ gamma/beta), with
    # 2x headroom for in-kernel f32 temps.  Floor 32 MiB, cap 48 MiB so it
    # fits v7x's 64 MiB physical VMEM and raises v5e/v6e defaults as needed.
    itemsize = jnp.dtype(x.dtype).itemsize
    buf_bytes = t * d_model * (2 * itemsize + 2 * itemsize) + 4 * d_model * 4
    vmem_limit = int(min(max(2 * buf_bytes, 32 * 1024 * 1024),
                         48 * 1024 * 1024))

    out = pl.pallas_call(
        functools.partial(_layer_norm_kernel, eps=eps, d_model=d_model),
        out_shape=jax.ShapeDtypeStruct((n, d_model), x.dtype),
        grid_spec=pltpu.PrefetchScalarGridSpec(
            num_scalar_prefetch=0,
            grid=grid,
            in_specs=[
                pl.BlockSpec((t, d_model), lambda i: (i, 0)),   # x rows
                pl.BlockSpec((1, d_model), lambda i: (0, 0)),   # gamma
                pl.BlockSpec((1, d_model), lambda i: (0, 0)),   # beta
            ],
            out_specs=pl.BlockSpec((t, d_model), lambda i: (i, 0)),
        ),
        compiler_params=pltpu.CompilerParams(
            dimension_semantics=("parallel",),   # row axis shards across TCs
            vmem_limit_bytes=vmem_limit,
        ),
    )(x2, gamma2, beta2)

    return out.reshape(orig_shape)


# ---------------------------------------------------------------------------
# Decoder.forward: loop over opaque layers, then the Pallas LayerNorm.
# ---------------------------------------------------------------------------
def decoder_forward(x, memory, src_mask, tgt_mask, layers, norm_gamma,
                    norm_beta, *, eps=1e-6):
    # TODO(synk): `DecoderLayer` is injected into Decoder and is not defined in
    # this module's spec; each element of `layers` is an arbitrary callable
    # layer(x, memory, src_mask, tgt_mask) -> x (mirrors the nn.ModuleList loop).
    for layer in layers:
        x = layer(x, memory, src_mask, tgt_mask)
    return layer_norm(x, norm_gamma, norm_beta, eps=eps)


# ---------------------------------------------------------------------------
# Demo / correctness check
# ---------------------------------------------------------------------------
def _make_demo_layer(key, d_model):
    """Simple deterministic stand-in for DecoderLayer that uses all four args."""
    k1, k2 = jax.random.split(key)
    w_self = jax.random.normal(k1, (d_model, d_model), jnp.float32) * 0.02
    w_mem = jax.random.normal(k2, (d_model, d_model), jnp.float32) * 0.02

    def layer(x, memory, src_mask, tgt_mask):
        self_mix = jnp.einsum(
            "bqk,bkd->bqd", tgt_mask.astype(x.dtype), x) / tgt_mask.shape[-1]
        cross_mix = jnp.einsum(
            "bqk,bkd->bqd", src_mask.astype(x.dtype), memory) / src_mask.shape[-1]
        return x + jnp.tanh(self_mix @ w_self) + jnp.tanh(cross_mix @ w_mem)

    return layer


def _torch_layernorm_ref(x, gamma, beta, eps):
    mean = jnp.mean(x, axis=-1, keepdims=True)
    std = jnp.std(x, axis=-1, ddof=1, keepdims=True)   # unbiased, like torch
    return gamma * (x - mean) / (std + eps) + beta


if __name__ == "__main__":
    B, S_TGT, S_SRC, D, N_LAYERS = 2, 8, 10, 128, 3

    key = jax.random.PRNGKey(0)
    kx, km, kl, kg, kb = jax.random.split(key, 5)

    x = jax.random.normal(kx, (B, S_TGT, D), jnp.float32)
    memory = jax.random.normal(km, (B, S_SRC, D), jnp.float32)
    tgt_mask = jnp.broadcast_to(
        jnp.tril(jnp.ones((S_TGT, S_TGT), jnp.float32))[None], (B, S_TGT, S_TGT))
    src_mask = jnp.ones((B, S_TGT, S_SRC), jnp.float32)

    layers = [_make_demo_layer(k, D) for k in jax.random.split(kl, N_LAYERS)]

    # LayerNorm params (random so the affine part is actually exercised;
    # the module's init would be ones / zeros).
    gamma = 1.0 + 0.1 * jax.random.normal(kg, (D,), jnp.float32)
    beta = 0.1 * jax.random.normal(kb, (D,), jnp.float32)

    out = decoder_forward(x, memory, src_mask, tgt_mask, layers, gamma, beta)
    out = jax.block_until_ready(out)

    # Reference: identical layer loop in plain JAX + torch-style LayerNorm.
    x_ref = x
    for layer in layers:
        x_ref = layer(x_ref, memory, src_mask, tgt_mask)
    ref = _torch_layernorm_ref(x_ref, gamma, beta, 1e-6)

    assert out.shape == (B, S_TGT, D)
    assert jnp.allclose(out, ref, atol=1e-5, rtol=1e-5)

    print("KERNEL_OK")
</pallas_src>

<mosaic_0001>
module attributes {stable_mosaic.version = 11 : i64} {
  func.func @_layer_norm_kernel(%arg0: i32, %arg1: memref<16x128xf32, #tpu.memory_space<vmem>>, %arg2: memref<1x128xf32, #tpu.memory_space<vmem>>, %arg3: memref<1x128xf32, #tpu.memory_space<vmem>>, %arg4: memref<16x128xf32, #tpu.memory_space<vmem>>) attributes {dimension_semantics = [#tpu.dimension_semantics<parallel>], iteration_bounds = array<i64: 1>, scalar_prefetch = 0 : i64, scratch_operands = 0 : i64, tpu.core_type = #tpu.core_type<tc>, window_params = [{transform_indices = @transform_0, window_bounds = array<i64: 16, 128>}, {pipeline_mode = #tpu.pipeline_mode<synchronous>, transform_indices = @transform_1, window_bounds = array<i64: 1, 128>}, {pipeline_mode = #tpu.pipeline_mode<synchronous>, transform_indices = @transform_2, window_bounds = array<i64: 1, 128>}, {transform_indices = @transform_3, window_bounds = array<i64: 16, 128>}]} {
    %c0 = arith.constant 0 : index
    %c0_0 = arith.constant 0 : index
    %0 = vector.load %arg1[%c0, %c0_0] : memref<16x128xf32, #tpu.memory_space<vmem>>, vector<16x128xf32>
    %cst = arith.constant dense<0.000000e+00> : vector<16xf32>
    %1 = vector.multi_reduction <add>, %0, %cst [1] : vector<16x128xf32> to vector<16xf32>
    %2 = vector.shape_cast %1 : vector<16xf32> to vector<16x1xf32>
    %cst_1 = arith.constant 7.812500e-03 : f32
    %3 = vector.broadcast %cst_1 : f32 to vector<16x1xf32>
    %4 = arith.mulf %2, %3 : vector<16x1xf32>
    %5 = vector.broadcast %4 : vector<16x1xf32> to vector<16x128xf32>
    %6 = arith.subf %0, %5 : vector<16x128xf32>
    %7 = arith.mulf %6, %6 : vector<16x128xf32>
    %cst_2 = arith.constant dense<0.000000e+00> : vector<16xf32>
    %8 = vector.multi_reduction <add>, %7, %cst_2 [1] : vector<16x128xf32> to vector<16xf32>
    %9 = vector.shape_cast %8 : vector<16xf32> to vector<16x1xf32>
    %cst_3 = arith.constant 0.00787401571 : f32
    %10 = vector.broadcast %cst_3 : f32 to vector<16x1xf32>
    %11 = arith.mulf %9, %10 : vector<16x1xf32>
    %12 = math.sqrt %11 : vector<16x1xf32>
    %cst_4 = arith.constant 9.99999997E-7 : f32
    %13 = vector.broadcast %cst_4 : f32 to vector<16x1xf32>
    %14 = arith.addf %12, %13 : vector<16x1xf32>
    %15 = tpu.reciprocal %14 : vector<16x1xf32> -> vector<16x1xf32>
    %c0_5 = arith.constant 0 : index
    %c0_6 = arith.constant 0 : index
    %16 = vector.load %arg2[%c0_5, %c0_6] : memref<1x128xf32, #tpu.memory_space<vmem>>, vector<1x128xf32>
    %17 = vector.broadcast %15 : vector<16x1xf32> to vector<16x128xf32>
    %18 = arith.mulf %6, %17 : vector<16x128xf32>
    %19 = vector.broadcast %16 : vector<1x128xf32> to vector<16x128xf32>
    %20 = arith.mulf %19, %18 : vector<16x128xf32>
    %c0_7 = arith.constant 0 : index
    %c0_8 = arith.constant 0 : index
    %21 = vector.load %arg3[%c0_7, %c0_8] : memref<1x128xf32, #tpu.memory_space<vmem>>, vector<1x128xf32>
    %22 = vector.broadcast %21 : vector<1x128xf32> to vector<16x128xf32>
    %23 = arith.addf %20, %22 : vector<16x128xf32>
    %c0_9 = arith.constant 0 : index
    %c0_10 = arith.constant 0 : index
    %24 = vector.load %arg4[%c0_9, %c0_10] : memref<16x128xf32, #tpu.memory_space<vmem>>, vector<16x128xf32>
    tpu.vector_store %arg4[%c0_9, %c0_10], %23 {strides = array<i32>} : memref<16x128xf32, #tpu.memory_space<vmem>>, vector<16x128xf32>,
    return
  }
  func.func @transform_0(%arg0: i32) -> (i32, i32) {
    %c0_i32 = arith.constant 0 : i32
    %c0_i32_0 = arith.constant 0 : i32
    return %arg0, %c0_i32 : i32, i32
  }
  func.func @transform_1(%arg0: i32) -> (i32, i32) {
    %c0_i32 = arith.constant 0 : i32
    %c0_i32_0 = arith.constant 0 : i32
    %c0_i32_1 = arith.constant 0 : i32
    return %c0_i32, %c0_i32_0 : i32, i32
  }
  func.func @transform_2(%arg0: i32) -> (i32, i32) {
    %c0_i32 = arith.constant 0 : i32
    %c0_i32_0 = arith.constant 0 : i32
    %c0_i32_1 = arith.constant 0 : i32
    return %c0_i32, %c0_i32_0 : i32, i32
  }
  func.func @transform_3(%arg0: i32) -> (i32, i32) {
    %c0_i32 = arith.constant 0 : i32
    %c0_i32_0 = arith.constant 0 : i32
    return %arg0, %c0_i32 : i32, i32
  }
}

</mosaic_0001>

<bundles_post_ra>
// kernel: tpu_custom_call.1
= control target key start
LH: loop header
LB: loop body
LE: loop exit
PB: predicated region body
PF: predicated region fallthrough
CT: control target
= control target key end

     0   :  { %8 = vsyncpa [#allocation3], 0  ;;  %s204_s0 = inlined_call_operand.hbm [shape: f32[16,128], index: 0, kind: input, shape index: {}]   ;;  %s205_s1 = inlined_call_operand.vmem [shape: f32[1,128], index: 1, kind: input, shape index: {}]   ;;  %s206_s2 = inlined_call_operand.vmem [shape: f32[1,128], index: 2, kind: input, shape index: {}]   ;;  %s207_s3 = inlined_call_operand.hbm [shape: f32[16,128], index: 3, kind: output, shape index: {}]  }
   0x1   :  { %9 = vsyncpa [#allocation4], 0  ;;  %s162_s12 = smov [#allocation2]  }
   0x2   :  { %s15_s13 = sshll.u32 %s162_s12, 4  ;;  %s16_s13 = int_to_ptr.vmem [resolvable:$true] %s15_s13 }
   0x3   :  { %s126_s14 = scalar_lea.vmem %s16_s13, 256  ;;  %p131_p1 = scmp.lt.s32.totalorder %s16_s13, %s16_s13 }
   0x4   :  { %p127_p0 = scmp.ne.s32.totalorder %s16_s13, %s126_s14  ;;  %p132_p2 = scmp.lt.s32.totalorder %s126_s14, %s126_s14 }
   0x6   :  { %p133_p3 = por %p132_p2, %p131_p1 }
   0x8   :  { %p134_p4 = pnand %p133_p3, %p127_p0 }
   0xa   :  { %137 = shalt.err (!%p134_p4)
}
   0xb   :  { %s163_s15 = smov 128   ;;  %s164_s16 = smov 8  }
   0xc   :  { %21 = dma.hbm_to_vmem [thread:$0]  %s204_s0, 256, %s16_s13, [#allocation3], %s163_s15, %s163_s15, %s164_s16  }
   0xd   :  { %158 = dma.done.wait [#allocation3], 256  }
   0xe   :  { %159 = vsyncadd [#allocation3], 4294967040  ;;  %v29_v0 = vld [vmem:[#allocation2] sm:$0xff]  ;;  %v30_v1 = vld [vmem:[#allocation2 + $0x8] sm:$0xff]  ;;  %s165_s22 = smov [#allocation5]  }
   0xf   :  { %31 = vadd.xlane.f32.xlu0 %v29_v0  ;;  %v104_v27 = vld [vmem:[%s205_s1] ss:$0 sm:$0xff]  ;;  %s92_s23 = sshll.u32 %s165_s22, 4  ;;  %s93_s23 = int_to_ptr.vmem [resolvable:$true] %s92_s23 }
  0x10   :  { %v105_v29 = vld [vmem:[%s206_s2] ss:$0 sm:$0xff]  ;;  %s138_s24 = scalar_lea.vmem %s93_s23, 256  ;;  %p143_p6 = scmp.lt.s32.totalorder %s93_s23, %s93_s23 }
  0x11   :  { %p139_p5 = scmp.ne.s32.totalorder %s93_s23, %s138_s24  ;;  %p144_p7 = scmp.lt.s32.totalorder %s138_s24, %s138_s24 }
  0x13   :  { %33 = vadd.xlane.f32.xlu0 %v30_v1  ;;  %p145_p8 = por %p144_p7, %p143_p6 }
  0x15   :  { %p146_p9 = pnand %p145_p8, %p139_p5 }
  0x98   :  { %v32_v2 = vpop.xlane.xlu0 %31 }
  0x99   :  { %v35_v3 = vmul.f32 0.0078125, %v32_v2 }
  0x9b   :  { %v37_v4 = vsub.f32 %v29_v0, %v35_v3 }
  0x9c   :  { %v34_v5 = vpop.xlane.xlu0 %33 }
  0x9d   :  { %v36_v6 = vmul.f32 0.0078125, %v34_v5  ;;  %v39_v7 = vmul.f32 %v37_v4, %v37_v4 }
  0x9f   :  { %v38_v8 = vsub.f32 %v30_v1, %v36_v6  ;;  %41 = vadd.xlane.f32.xlu1 %v39_v7 }
  0xa1   :  { %v40_v9 = vmul.f32 %v38_v8, %v38_v8 }
  0xa3   :  { %43 = vadd.xlane.f32.xlu1 %v40_v9 }
 0x128   :  { %v42_v10 = vpop.xlane.xlu1 %41 }
 0x129   :  { %v45_v11 = vmul.f32 0.007874016, %v42_v10 }
 0x12b   :  { %110 = vrsqrt.f32 %v45_v11  ;;  %vm49_vm0 = vcmp.eq.f32.partialorder %v45_v11, inf  ;;  %v52_v16 = vand.u32 2147483648, %v45_v11  ;;  %vm51_vm1 = vcmp.eq.f32.partialorder %v45_v11, 0.0 }
 0x12c   :  { %v44_v12 = vpop.xlane.xlu1 %43 }
 0x12d   :  { %v46_v13 = vmul.f32 0.007874016, %v44_v12 }
 0x12f   :  { %112 = vrsqrt.f32 %v46_v13  ;;  %vm56_vm2 = vcmp.eq.f32.partialorder %v46_v13, inf  ;;  %v59_v22 = vand.u32 2147483648, %v46_v13  ;;  %vm58_vm3 = vcmp.eq.f32.partialorder %v46_v13, 0.0 }
 0x138   :  { %v111_v14 = vpop.eup %110 }
 0x139   :  { %v48_v15 = vmul.f32 %v111_v14, %v45_v11 }
 0x13b   :  { %v50_v17 = vsel %vm49_vm0, %v45_v11, %v48_v15 }
 0x13c   :  { %v113_v18 = vpop.eup %112  ;;  %v53_v19 = vsel %vm51_vm1, %v52_v16, %v50_v17 }
 0x13d   :  { %v61_v20 = vadd.f32 1e-06, %v53_v19  ;;  %v55_v21 = vmul.f32 %v113_v18, %v46_v13 }
 0x13f   :  { %114 = vrcp.f32 %v61_v20  ;;  %v57_v23 = vsel %vm56_vm2, %v46_v13, %v55_v21 }
 0x140   :  { %v60_v24 = vsel %vm58_vm3, %v59_v22, %v57_v23 }
 0x141   :  { %v62_v25 = vadd.f32 1e-06, %v60_v24 }
 0x143   :  { %116 = vrcp.f32 %v62_v25 }
 0x14c   :  { %v115_v26 = vpop.eup %114 }
 0x14d   :  { %v66_v28 = vmul.f32 %v115_v26, %v37_v4 }
 0x14f   :  { %v74_v30 = vmul.f32 %v104_v27, %v66_v28 }
 0x150   :  { %v117_v31 = vpop.eup %116 }
 0x151   :  { %v67_v32 = vmul.f32 %v117_v31, %v38_v8  ;;  %v83_v33 = vadd.f32 %v105_v29, %v74_v30 }
 0x153   :  { %v75_v34 = vmul.f32 %v104_v27, %v67_v32  ;;  %85 = vst [vmem:[#allocation5] sm:$0xff] %v83_v33 }
 0x155   :  { %v84_v35 = vadd.f32 %v105_v29, %v75_v34 }
 0x157   :  { %86 = vst [vmem:[#allocation5 + $0x8] sm:$0xff] %v84_v35 }
 0x158   :  { %149 = shalt.err (!%p146_p9)
}
 0x159   :  { %98 = dma.vmem_to_hbm [thread:$0]  %s93_s23, 256, %s207_s3, [#allocation4], %s163_s15, %s163_s15, %s164_s16  }
 0x15a   :  { %160 = dma.done.wait [#allocation4], 256  }
 0x15b   :  { %161 = vsyncadd [#allocation4], 4294967040 }
 0x15c   :  { %102 = vsyncpa [#allocation3], 1 }
 0x15d   :  { %103 = vsyncpa [#allocation4], 1 }

</bundles_post_ra>
